<compile_context>
chip_gen: v7x
topology: tpu7x:2x2x1
jax: 0.10.0
libtpu: 0.0.40
codegen_flags: <defaults>
</compile_context>

<pallas_src>
import functools

import jax
import jax.numpy as jnp
from jax.experimental import pallas as pl
from jax.experimental.pallas import tpu as pltpu

LATENT_DIM = 2

F_IN = 784          # MNIST flattened
F_PAD = 896         # 7 * 128 (lane-dense padding of the 784 axis)

# ---- packed small-parameter buffer layout (rows x 128 lanes, f32) ----------
# All row offsets are multiples of 8 (sublane-aligned).
_OFF_B1 = 0      # b1  [1, 32]
_OFF_W2 = 8      # w2  [32, 16]
_OFF_B2 = 40     # b2  [1, 16]
_OFF_W3 = 48     # w3  [16, 2*latent]   (merged mu|logvar head)
_OFF_B3 = 64     # b3  [1, 2*latent]
_OFF_W4 = 72     # w4  [latent, 16]
_OFF_B4 = 80     # b4  [1, 16]
_OFF_W5 = 88     # w5  [16, 32]
_OFF_B5 = 104    # b5  [1, 32]
_SP_ROWS = 112   # padded to a multiple of 8
_SP_LANES = 128


def _vae_kernel(x_ref, eps_ref, w1_ref, w6_ref, b6_ref, sp_ref,
                xhat_ref, mulv_ref, *, latent_dim):
    L = latent_dim

    # --- unpack small params (static, sublane-aligned slices) ---
    b1 = sp_ref[_OFF_B1:_OFF_B1 + 1, 0:32]
    w2 = sp_ref[_OFF_W2:_OFF_W2 + 32, 0:16]
    b2 = sp_ref[_OFF_B2:_OFF_B2 + 1, 0:16]
    w3 = sp_ref[_OFF_W3:_OFF_W3 + 16, 0:2 * L]
    b3 = sp_ref[_OFF_B3:_OFF_B3 + 1, 0:2 * L]
    w4 = sp_ref[_OFF_W4:_OFF_W4 + L, 0:16]
    b4 = sp_ref[_OFF_B4:_OFF_B4 + 1, 0:16]
    w5 = sp_ref[_OFF_W5:_OFF_W5 + 16, 0:32]
    b5 = sp_ref[_OFF_B5:_OFF_B5 + 1, 0:32]

    x = x_ref[...]                                       # bf16 [TB, 896]

    # ---------- encode ----------
    h = jnp.dot(x, w1_ref[...], preferred_element_type=jnp.float32) + b1
    h = jnp.maximum(h, 0.0)                              # relu
    h = jnp.dot(h, w2, preferred_element_type=jnp.float32) + b2
    h = jnp.maximum(h, 0.0)                              # relu
    mulv = jnp.dot(h, w3, preferred_element_type=jnp.float32) + b3  # [TB, 2L]

    mu = mulv[:, :L]
    logvar = mulv[:, L:]

    # ---------- reparameterize ----------
    std = jnp.exp(0.5 * logvar)
    z = mu + std * eps_ref[...]

    # ---------- decode ----------
    d = jnp.dot(z, w4, preferred_element_type=jnp.float32) + b4
    d = jnp.maximum(d, 0.0)                              # relu
    d = jnp.dot(d, w5, preferred_element_type=jnp.float32) + b5
    d = jnp.maximum(d, 0.0)                              # relu
    logits = (jnp.dot(d.astype(jnp.bfloat16), w6_ref[...],
                      preferred_element_type=jnp.float32) + b6_ref[...])

    # sigmoid(x) = 0.5 * (tanh(x/2) + 1): stable + runs on the EUP slot.
    xhat = 0.5 * (jnp.tanh(0.5 * logits) + 1.0)

    xhat_ref[...] = xhat.astype(xhat_ref.dtype)
    mulv_ref[...] = mulv.astype(mulv_ref.dtype)


def init_vae_params(key, latent_dim=LATENT_DIM):
    """PyTorch-style uniform(+-1/sqrt(fan_in)) init.

    Weights returned as [in, out]; biases as [1, out]. fc_enc3 is kept merged
    ([16, 2*latent]) — mu/logvar are sliced inside the kernel.
    """
    sizes = [
        ("fc_enc1", F_IN, 32),
        ("fc_enc2", 32, 16),
        ("fc_enc3", 16, 2 * latent_dim),
        ("fc_dec1", latent_dim, 16),
        ("fc_dec2", 16, 32),
        ("fc_dec3", 32, F_IN),
    ]
    params = {}
    keys = jax.random.split(key, 2 * len(sizes))
    for i, (name, fan_in, fan_out) in enumerate(sizes):
        bound = 1.0 / jnp.sqrt(jnp.float32(fan_in))
        w = jax.random.uniform(keys[2 * i], (fan_in, fan_out), jnp.float32,
                               minval=-bound, maxval=bound)
        b = jax.random.uniform(keys[2 * i + 1], (1, fan_out), jnp.float32,
                               minval=-bound, maxval=bound)
        params[name] = (w, b)
    return params


def _pack_small_params(params, latent_dim):
    """Pack the tiny weights/biases into one [112, 128] f32 buffer."""
    sp = jnp.zeros((_SP_ROWS, _SP_LANES), jnp.float32)

    def put(buf, off, arr):
        r, c = arr.shape
        return buf.at[off:off + r, 0:c].set(arr.astype(jnp.float32))

    _, b1 = params["fc_enc1"]
    w2, b2 = params["fc_enc2"]
    w3, b3 = params["fc_enc3"]
    w4, b4 = params["fc_dec1"]
    w5, b5 = params["fc_dec2"]

    sp = put(sp, _OFF_B1, b1)
    sp = put(sp, _OFF_W2, w2)
    sp = put(sp, _OFF_B2, b2)
    sp = put(sp, _OFF_W3, w3)
    sp = put(sp, _OFF_B3, b3)
    sp = put(sp, _OFF_W4, w4)
    sp = put(sp, _OFF_B4, b4)
    sp = put(sp, _OFF_W5, w5)
    sp = put(sp, _OFF_B5, b5)
    return sp


@functools.partial(jax.jit, static_argnames=("latent_dim",))
def vae_forward(x, eps, params, latent_dim=LATENT_DIM):
    """x: [B, 784] f32, eps: [B, latent_dim] f32 (the randn_like draw)."""
    B = x.shape[0]

    # Batch tile: multiple of 8 sublanes, capped so tiles stay tiny vs VMEM
    # (bf16 x-tile + f32 xhat-tile at 512 rows ~= 2.6 MiB per buffer).
    TILE_B = min(512, max(8, ((B + 7) // 8) * 8))
    B_pad = ((B + TILE_B - 1) // TILE_B) * TILE_B
    grid = (B_pad // TILE_B,)

    w1, _ = params["fc_enc1"]
    w6, b6 = params["fc_dec3"]

    # Pad/cast the big operands: 784 -> 896 (zero pad), bf16 for MXU + HBM BW.
    x_p = jnp.zeros((B_pad, F_PAD), jnp.bfloat16).at[:B, :F_IN].set(
        x.astype(jnp.bfloat16))
    eps_p = jnp.zeros((B_pad, latent_dim), jnp.float32).at[:B, :].set(eps)
    w1_p = jnp.zeros((F_PAD, 32), jnp.bfloat16).at[:F_IN, :].set(
        w1.astype(jnp.bfloat16))
    w6_p = jnp.zeros((32, F_PAD), jnp.bfloat16).at[:, :F_IN].set(
        w6.astype(jnp.bfloat16))
    b6_p = jnp.zeros((1, F_PAD), jnp.float32).at[:, :F_IN].set(b6)
    sp = _pack_small_params(params, latent_dim)

    kernel = functools.partial(_vae_kernel, latent_dim=latent_dim)

    out_shape = (
        jax.ShapeDtypeStruct((B_pad, F_PAD), jnp.float32),           # xHat (padded)
        jax.ShapeDtypeStruct((B_pad, 2 * latent_dim), jnp.float32),  # mu|logvar
    )

    xhat_p, mulv = pl.pallas_call(
        kernel,
        out_shape=out_shape,
        grid=grid,
        in_specs=[
            pl.BlockSpec((TILE_B, F_PAD), lambda i: (i, 0)),        # x tile
            pl.BlockSpec((TILE_B, latent_dim), lambda i: (i, 0)),   # eps tile
            pl.BlockSpec((F_PAD, 32), lambda i: (0, 0)),            # w1 (resident)
            pl.BlockSpec((32, F_PAD), lambda i: (0, 0)),            # w6 (resident)
            pl.BlockSpec((1, F_PAD), lambda i: (0, 0)),             # b6 (resident)
            pl.BlockSpec((_SP_ROWS, _SP_LANES), lambda i: (0, 0)),  # packed small params
        ],
        out_specs=(
            pl.BlockSpec((TILE_B, F_PAD), lambda i: (i, 0)),
            pl.BlockSpec((TILE_B, 2 * latent_dim), lambda i: (i, 0)),
        ),
        compiler_params=pltpu.CompilerParams(
            dimension_semantics=("parallel",),          # megacore on v7x
            vmem_limit_bytes=48 * 1024 * 1024,          # safe on 64 MiB v7x VMEM
        ),
    )(x_p, eps_p, w1_p, w6_p, b6_p, sp)

    xhat = xhat_p[:B, :F_IN]
    mu = mulv[:B, :latent_dim]
    logvar = mulv[:B, latent_dim:]
    return xhat, mu, logvar


def _reference_forward(x, eps, params, latent_dim=LATENT_DIM):
    """Plain-JAX reference (same bf16 casts on the big matmuls as the kernel)."""
    bf = jnp.bfloat16
    w1, b1 = params["fc_enc1"]
    w2, b2 = params["fc_enc2"]
    w3, b3 = params["fc_enc3"]
    w4, b4 = params["fc_dec1"]
    w5, b5 = params["fc_dec2"]
    w6, b6 = params["fc_dec3"]

    h = jax.nn.relu(jnp.dot(x.astype(bf), w1.astype(bf),
                            preferred_element_type=jnp.float32) + b1)
    h = jax.nn.relu(h @ w2 + b2)
    mulv = h @ w3 + b3
    mu, logvar = mulv[:, :latent_dim], mulv[:, latent_dim:]
    z = mu + jnp.exp(0.5 * logvar) * eps
    d = jax.nn.relu(z @ w4 + b4)
    d = jax.nn.relu(d @ w5 + b5)
    logits = jnp.dot(d.astype(bf), w6.astype(bf),
                     preferred_element_type=jnp.float32) + b6
    xhat = jax.nn.sigmoid(logits)
    return xhat, mu, logvar


if __name__ == "__main__":
    key = jax.random.PRNGKey(0)
    k_params, k_x, k_eps = jax.random.split(key, 3)

    B = 8
    params = init_vae_params(k_params, LATENT_DIM)
    x = jax.random.uniform(k_x, (B, F_IN), jnp.float32)            # flattened "MNIST"
    eps = jax.random.normal(k_eps, (B, LATENT_DIM), jnp.float32)   # randn_like(std)

    xhat, mu, logvar = vae_forward(x, eps, params)
    jax.block_until_ready((xhat, mu, logvar))

    # sanity check against plain-JAX reference
    xhat_r, mu_r, logvar_r = _reference_forward(x, eps, params, LATENT_DIM)
    assert xhat.shape == (B, F_IN)
    assert mu.shape == (B, LATENT_DIM) and logvar.shape == (B, LATENT_DIM)
    assert jnp.allclose(xhat, xhat_r, atol=5e-3), float(jnp.max(jnp.abs(xhat - xhat_r)))
    assert jnp.allclose(mu, mu_r, atol=5e-3), float(jnp.max(jnp.abs(mu - mu_r)))
    assert jnp.allclose(logvar, logvar_r, atol=5e-3), float(jnp.max(jnp.abs(logvar - logvar_r)))

    print("KERNEL_OK")
</pallas_src>

<mosaic_0001>
module attributes {stable_mosaic.version = 11 : i64} {
  func.func @_vae_kernel(%arg0: i32, %arg1: memref<8x896xbf16, #tpu.memory_space<vmem>>, %arg2: memref<8x2xf32, #tpu.memory_space<vmem>>, %arg3: memref<896x32xbf16, #tpu.memory_space<vmem>>, %arg4: memref<32x896xbf16, #tpu.memory_space<vmem>>, %arg5: memref<1x896xf32, #tpu.memory_space<vmem>>, %arg6: memref<112x128xf32, #tpu.memory_space<vmem>>, %arg7: memref<8x896xf32, #tpu.memory_space<vmem>>, %arg8: memref<8x4xf32, #tpu.memory_space<vmem>>) attributes {dimension_semantics = [#tpu.dimension_semantics<parallel>], iteration_bounds = array<i64: 1>, scalar_prefetch = 0 : i64, scratch_operands = 0 : i64, tpu.core_type = #tpu.core_type<tc>, window_params = [{transform_indices = @transform_0, window_bounds = array<i64: 8, 896>}, {transform_indices = @transform_1, window_bounds = array<i64: 8, 2>}, {pipeline_mode = #tpu.pipeline_mode<synchronous>, transform_indices = @transform_2, window_bounds = array<i64: 896, 32>}, {pipeline_mode = #tpu.pipeline_mode<synchronous>, transform_indices = @transform_3, window_bounds = array<i64: 32, 896>}, {pipeline_mode = #tpu.pipeline_mode<synchronous>, transform_indices = @transform_4, window_bounds = array<i64: 1, 896>}, {pipeline_mode = #tpu.pipeline_mode<synchronous>, transform_indices = @transform_5, window_bounds = array<i64: 112, 128>}, {transform_indices = @transform_6, window_bounds = array<i64: 8, 896>}, {transform_indices = @transform_7, window_bounds = array<i64: 8, 4>}]} {
    %c0 = arith.constant 0 : index
    %c0_0 = arith.constant 0 : index
    %0 = vector.load %arg6[%c0, %c0_0] : memref<112x128xf32, #tpu.memory_space<vmem>>, vector<1x32xf32>
    %c8 = arith.constant 8 : index
    %c0_1 = arith.constant 0 : index
    %1 = vector.load %arg6[%c8, %c0_1] : memref<112x128xf32, #tpu.memory_space<vmem>>, vector<32x16xf32>
    %c40 = arith.constant 40 : index
    %c0_2 = arith.constant 0 : index
    %2 = vector.load %arg6[%c40, %c0_2] : memref<112x128xf32, #tpu.memory_space<vmem>>, vector<1x16xf32>
    %c48 = arith.constant 48 : index
    %c0_3 = arith.constant 0 : index
    %3 = vector.load %arg6[%c48, %c0_3] : memref<112x128xf32, #tpu.memory_space<vmem>>, vector<16x4xf32>
    %c64 = arith.constant 64 : index
    %c0_4 = arith.constant 0 : index
    %4 = vector.load %arg6[%c64, %c0_4] : memref<112x128xf32, #tpu.memory_space<vmem>>, vector<1x4xf32>
    %c72 = arith.constant 72 : index
    %c0_5 = arith.constant 0 : index
    %5 = vector.load %arg6[%c72, %c0_5] : memref<112x128xf32, #tpu.memory_space<vmem>>, vector<2x16xf32>
    %c80 = arith.constant 80 : index
    %c0_6 = arith.constant 0 : index
    %6 = vector.load %arg6[%c80, %c0_6] : memref<112x128xf32, #tpu.memory_space<vmem>>, vector<1x16xf32>
    %c88 = arith.constant 88 : index
    %c0_7 = arith.constant 0 : index
    %7 = vector.load %arg6[%c88, %c0_7] : memref<112x128xf32, #tpu.memory_space<vmem>>, vector<16x32xf32>
    %c104 = arith.constant 104 : index
    %c0_8 = arith.constant 0 : index
    %8 = vector.load %arg6[%c104, %c0_8] : memref<112x128xf32, #tpu.memory_space<vmem>>, vector<1x32xf32>
    %c0_9 = arith.constant 0 : index
    %c0_10 = arith.constant 0 : index
    %9 = vector.load %arg1[%c0_9, %c0_10] : memref<8x896xbf16, #tpu.memory_space<vmem>>, vector<8x896xbf16>
    %c0_11 = arith.constant 0 : index
    %c0_12 = arith.constant 0 : index
    %10 = vector.load %arg3[%c0_11, %c0_12] : memref<896x32xbf16, #tpu.memory_space<vmem>>, vector<896x32xbf16>
    %cst = arith.constant dense<0.000000e+00> : vector<8x32xf32>
    %11 = tpu.matmul %9, %10, %cst {dimension_numbers = #tpu.dot_dimension_numbers<[1], [0], [0], [1], [0, 0, 1, 1], [], []>} : vector<8x896xbf16>, vector<896x32xbf16>, vector<8x32xf32> -> vector<8x32xf32>
    %12 = vector.broadcast %0 : vector<1x32xf32> to vector<8x32xf32>
    %13 = arith.addf %11, %12 : vector<8x32xf32>
    %cst_13 = arith.constant 0.000000e+00 : f32
    %14 = vector.broadcast %cst_13 : f32 to vector<8x32xf32>
    %15 = arith.maximumf %13, %14 : vector<8x32xf32>
    %cst_14 = arith.constant dense<0.000000e+00> : vector<8x16xf32>
    %16 = tpu.matmul %15, %1, %cst_14 {dimension_numbers = #tpu.dot_dimension_numbers<[1], [0], [0], [1], [0, 0, 1, 1], [], []>} : vector<8x32xf32>, vector<32x16xf32>, vector<8x16xf32> -> vector<8x16xf32>
    %17 = vector.broadcast %2 : vector<1x16xf32> to vector<8x16xf32>
    %18 = arith.addf %16, %17 : vector<8x16xf32>
    %cst_15 = arith.constant 0.000000e+00 : f32
    %19 = vector.broadcast %cst_15 : f32 to vector<8x16xf32>
    %20 = arith.maximumf %18, %19 : vector<8x16xf32>
    %cst_16 = arith.constant dense<0.000000e+00> : vector<8x4xf32>
    %21 = tpu.matmul %20, %3, %cst_16 {dimension_numbers = #tpu.dot_dimension_numbers<[1], [0], [0], [1], [0, 0, 1, 1], [], []>} : vector<8x16xf32>, vector<16x4xf32>, vector<8x4xf32> -> vector<8x4xf32>
    %22 = vector.broadcast %4 : vector<1x4xf32> to vector<8x4xf32>
    %23 = arith.addf %21, %22 : vector<8x4xf32>
    %24 = vector.extract_strided_slice %23 {offsets = [0, 0], sizes = [8, 2], strides = [1, 1]} : vector<8x4xf32> to vector<8x2xf32>
    %25 = vector.extract_strided_slice %23 {offsets = [0, 2], sizes = [8, 2], strides = [1, 1]} : vector<8x4xf32> to vector<8x2xf32>
    %cst_17 = arith.constant 5.000000e-01 : f32
    %26 = vector.broadcast %cst_17 : f32 to vector<8x2xf32>
    %27 = arith.mulf %26, %25 : vector<8x2xf32>
    %28 = math.exp %27 : vector<8x2xf32>
    %c0_18 = arith.constant 0 : index
    %c0_19 = arith.constant 0 : index
    %29 = vector.load %arg2[%c0_18, %c0_19] : memref<8x2xf32, #tpu.memory_space<vmem>>, vector<8x2xf32>
    %30 = arith.mulf %28, %29 : vector<8x2xf32>
    %31 = arith.addf %24, %30 : vector<8x2xf32>
    %cst_20 = arith.constant dense<0.000000e+00> : vector<8x16xf32>
    %32 = tpu.matmul %31, %5, %cst_20 {dimension_numbers = #tpu.dot_dimension_numbers<[1], [0], [0], [1], [0, 0, 1, 1], [], []>} : vector<8x2xf32>, vector<2x16xf32>, vector<8x16xf32> -> vector<8x16xf32>
    %33 = vector.broadcast %6 : vector<1x16xf32> to vector<8x16xf32>
    %34 = arith.addf %32, %33 : vector<8x16xf32>
    %cst_21 = arith.constant 0.000000e+00 : f32
    %35 = vector.broadcast %cst_21 : f32 to vector<8x16xf32>
    %36 = arith.maximumf %34, %35 : vector<8x16xf32>
    %cst_22 = arith.constant dense<0.000000e+00> : vector<8x32xf32>
    %37 = tpu.matmul %36, %7, %cst_22 {dimension_numbers = #tpu.dot_dimension_numbers<[1], [0], [0], [1], [0, 0, 1, 1], [], []>} : vector<8x16xf32>, vector<16x32xf32>, vector<8x32xf32> -> vector<8x32xf32>
    %38 = vector.broadcast %8 : vector<1x32xf32> to vector<8x32xf32>
    %39 = arith.addf %37, %38 : vector<8x32xf32>
    %cst_23 = arith.constant 0.000000e+00 : f32
    %40 = vector.broadcast %cst_23 : f32 to vector<8x32xf32>
    %41 = arith.maximumf %39, %40 : vector<8x32xf32>
    %42 = arith.truncf %41 : vector<8x32xf32> to vector<8x32xbf16>
    %c0_24 = arith.constant 0 : index
    %c0_25 = arith.constant 0 : index
    %43 = vector.load %arg4[%c0_24, %c0_25] : memref<32x896xbf16, #tpu.memory_space<vmem>>, vector<32x896xbf16>
    %cst_26 = arith.constant dense<0.000000e+00> : vector<8x896xf32>
    %44 = tpu.matmul %42, %43, %cst_26 {dimension_numbers = #tpu.dot_dimension_numbers<[1], [0], [0], [1], [0, 0, 1, 1], [], []>} : vector<8x32xbf16>, vector<32x896xbf16>, vector<8x896xf32> -> vector<8x896xf32>
    %c0_27 = arith.constant 0 : index
    %c0_28 = arith.constant 0 : index
    %45 = vector.load %arg5[%c0_27, %c0_28] : memref<1x896xf32, #tpu.memory_space<vmem>>, vector<1x896xf32>
    %46 = vector.broadcast %45 : vector<1x896xf32> to vector<8x896xf32>
    %47 = arith.addf %44, %46 : vector<8x896xf32>
    %cst_29 = arith.constant 5.000000e-01 : f32
    %48 = vector.broadcast %cst_29 : f32 to vector<8x896xf32>
    %49 = arith.mulf %48, %47 : vector<8x896xf32>
    %50 = math.tanh %49 : vector<8x896xf32>
    %cst_30 = arith.constant 1.000000e+00 : f32
    %51 = vector.broadcast %cst_30 : f32 to vector<8x896xf32>
    %52 = arith.addf %50, %51 : vector<8x896xf32>
    %cst_31 = arith.constant 5.000000e-01 : f32
    %53 = vector.broadcast %cst_31 : f32 to vector<8x896xf32>
    %54 = arith.mulf %53, %52 : vector<8x896xf32>
    %c0_32 = arith.constant 0 : index
    %c0_33 = arith.constant 0 : index
    %55 = vector.load %arg7[%c0_32, %c0_33] : memref<8x896xf32, #tpu.memory_space<vmem>>, vector<8x896xf32>
    tpu.vector_store %arg7[%c0_32, %c0_33], %54 {strides = array<i32>} : memref<8x896xf32, #tpu.memory_space<vmem>>, vector<8x896xf32>,
    %c0_34 = arith.constant 0 : index
    %c0_35 = arith.constant 0 : index
    %56 = vector.load %arg8[%c0_34, %c0_35] : memref<8x4xf32, #tpu.memory_space<vmem>>, vector<8x4xf32>
    tpu.vector_store %arg8[%c0_34, %c0_35], %23 {strides = array<i32>} : memref<8x4xf32, #tpu.memory_space<vmem>>, vector<8x4xf32>,
    return
  }
  func.func @transform_0(%arg0: i32) -> (i32, i32) {
    %c0_i32 = arith.constant 0 : i32
    %c0_i32_0 = arith.constant 0 : i32
    return %arg0, %c0_i32 : i32, i32
  }
  func.func @transform_1(%arg0: i32) -> (i32, i32) {
    %c0_i32 = arith.constant 0 : i32
    %c0_i32_0 = arith.constant 0 : i32
    return %arg0, %c0_i32 : i32, i32
  }
  func.func @transform_2(%arg0: i32) -> (i32, i32) {
    %c0_i32 = arith.constant 0 : i32
    %c0_i32_0 = arith.constant 0 : i32
    %c0_i32_1 = arith.constant 0 : i32
    return %c0_i32, %c0_i32_0 : i32, i32
  }
  func.func @transform_3(%arg0: i32) -> (i32, i32) {
    %c0_i32 = arith.constant 0 : i32
    %c0_i32_0 = arith.constant 0 : i32
    %c0_i32_1 = arith.constant 0 : i32
    return %c0_i32, %c0_i32_0 : i32, i32
  }
  func.func @transform_4(%arg0: i32) -> (i32, i32) {
    %c0_i32 = arith.constant 0 : i32
    %c0_i32_0 = arith.constant 0 : i32
    %c0_i32_1 = arith.constant 0 : i32
    return %c0_i32, %c0_i32_0 : i32, i32
  }
  func.func @transform_5(%arg0: i32) -> (i32, i32) {
    %c0_i32 = arith.constant 0 : i32
    %c0_i32_0 = arith.constant 0 : i32
    %c0_i32_1 = arith.constant 0 : i32
    return %c0_i32, %c0_i32_0 : i32, i32
  }
  func.func @transform_6(%arg0: i32) -> (i32, i32) {
    %c0_i32 = arith.constant 0 : i32
    %c0_i32_0 = arith.constant 0 : i32
    return %arg0, %c0_i32 : i32, i32
  }
  func.func @transform_7(%arg0: i32) -> (i32, i32) {
    %c0_i32 = arith.constant 0 : i32
    %c0_i32_0 = arith.constant 0 : i32
    return %arg0, %c0_i32 : i32, i32
  }
}

</mosaic_0001>

<bundles_post_ra>
// kernel: vae_forward.1
= control target key start
LH: loop header
LB: loop body
LE: loop exit
PB: predicated region body
PF: predicated region fallthrough
CT: control target
= control target key end

     0   :  { %v1744_v42 = vmov 0.0   ;;  %vm1745_vm0 = vmmov 0   ;;  %s2106_s0 = inlined_call_operand.vmem [shape: bf16[8,896], index: 0, kind: input, shape index: {}]   ;;  %s2107_s1 = inlined_call_operand.vmem [shape: f32[8,2], index: 1, kind: input, shape index: {}]   ;;  %s2108_s2 = inlined_call_operand.vmem [shape: bf16[896,32], index: 2, kind: input, shape index: {}]   ;;  %s2109_s3 = inlined_call_operand.vmem [shape: bf16[32,896], index: 3, kind: input, shape index: {}]   ;;  %s2110_s4 = inlined_call_operand.vmem [shape: f32[1,896], index: 4, kind: input, shape index: {}]   ;;  %s2111_s5 = inlined_call_operand.vmem [shape: f32[112,128], index: 5, kind: input, shape index: {}]   ;;  %s2112_s6 = inlined_call_operand.hbm [shape: f32[8,896], index: 6, kind: output, shape index: {0}]   ;;  %s2113_s7 = inlined_call_operand.vmem [shape: f32[8,4], index: 7, kind: output, shape index: {1}]  }
   0x1   :  { %v1621_v0 = vld [vmem:[%s2108_s2 + $0x40] sm:$0xff]   ;;  %v1625_v4 = vld [vmem:[%s2108_s2 + $0x48] sm:$0xff]   ;;  %v1629_v8 = vld [vmem:[%s2108_s2 + $0x50] sm:$0xff]  }
   0x2   :  { %v1622_v1 = vld [vmem:[%s2108_s2] sm:$0xff]   ;;  %1453 = vmatprep.subr.bf16.mxu0 %v1621_v0  ;;  %v1626_v5 = vld [vmem:[%s2108_s2 + $0x8] sm:$0xff]   ;;  %v1630_v9 = vld [vmem:[%s2108_s2 + $0x10] sm:$0xff]  }
   0x3   :  { %v1623_v2 = vld [vmem:[%s2108_s2 + $0xc0] sm:$0xff]   ;;  %1454 = vmatpush3.bf16.msra.mxu0 %v1622_v1  ;;  %v1627_v6 = vld [vmem:[%s2108_s2 + $0xc8] sm:$0xff]   ;;  %v1631_v10 = vld [vmem:[%s2108_s2 + $0xd0] sm:$0xff]  }
   0x4   :  { %v1624_v3 = vld [vmem:[%s2108_s2 + $0x80] sm:$0xff]   ;;  %1475 = vmatprep.subr.bf16.mxu1 %v1623_v2  ;;  %1455 = vmatprep.subr.bf16.mxu0 %v1625_v4  ;;  %v1628_v7 = vld [vmem:[%s2108_s2 + $0x88] sm:$0xff]   ;;  %v1632_v11 = vld [vmem:[%s2108_s2 + $0x90] sm:$0xff]  }
   0x5   :  { %1476 = vmatpush3.bf16.msra.mxu1 %v1624_v3  ;;  %v1633_v12 = vld [vmem:[%s2108_s2 + $0x58] sm:$0xff]   ;;  %v1637_v16 = vld [vmem:[%s2108_s2 + $0x60] sm:$0xff]   ;;  %v1641_v20 = vld [vmem:[%s2108_s2 + $0x68] sm:$0xff]  }
   0x6   :  { %1477 = vmatprep.subr.bf16.mxu1 %v1627_v6  ;;  %v1634_v13 = vld [vmem:[%s2108_s2 + $0x18] sm:$0xff]   ;;  %v1638_v17 = vld [vmem:[%s2108_s2 + $0x20] sm:$0xff]   ;;  %v1642_v21 = vld [vmem:[%s2108_s2 + $0x28] sm:$0xff]  }
   0x7   :  { %1456 = vmatpush3.bf16.msra.mxu0 %v1626_v5  ;;  %v1635_v14 = vld [vmem:[%s2108_s2 + $0xd8] sm:$0xff]   ;;  %v1639_v18 = vld [vmem:[%s2108_s2 + $0xe0] sm:$0xff]   ;;  %v1643_v22 = vld [vmem:[%s2108_s2 + $0xe8] sm:$0xff]  }
   0x8   :  { %1457 = vmatprep.subr.bf16.mxu0 %v1629_v8  ;;  %v1636_v15 = vld [vmem:[%s2108_s2 + $0x98] sm:$0xff]   ;;  %v1640_v19 = vld [vmem:[%s2108_s2 + $0xa0] sm:$0xff]   ;;  %v1644_v23 = vld [vmem:[%s2108_s2 + $0xa8] sm:$0xff]  }
   0x9   :  { %1478 = vmatpush3.bf16.msra.mxu1 %v1628_v7  ;;  %v1645_v24 = vld [vmem:[%s2108_s2 + $0x70] sm:$0xff]   ;;  %v1649_v28 = vld [vmem:[%s2108_s2 + $0x78] sm:$0xff]   ;;  %v41_v31 = vld [vmem:[%s2106_s0] sm:$0xff] }
   0xa   :  { %1479 = vmatprep.subr.bf16.mxu1 %v1631_v10  ;;  %v1646_v25 = vld [vmem:[%s2108_s2 + $0x30] sm:$0xff]   ;;  %v1650_v29 = vld [vmem:[%s2108_s2 + $0x38] sm:$0xff]   ;;  %v1363_v32 = vcombine.low %v41_v31, %v41_v31  ;;  %v1364_v33 = vcombine.high %v41_v31, %v41_v31  ;;  %v1655_v35 = vld [vmem:[%s2108_s2 + $0x140] sm:$0xff]  }
   0xb   :  { %1458 = vmatpush3.bf16.msra.mxu0 %v1630_v9  ;;  %v1647_v26 = vld [vmem:[%s2108_s2 + $0xf0] sm:$0xff]   ;;  %v1651_v30 = vld [vmem:[%s2108_s2 + $0xf8] sm:$0xff]   ;;  %v42_v36 = vld [vmem:[%s2106_s0 + $0x8] sm:$0xff] }
   0xc   :  { %1459 = vmatprep.subr.bf16.mxu0 %v1633_v12  ;;  %v1648_v27 = vld [vmem:[%s2108_s2 + $0xb0] sm:$0xff]   ;;  %v1654_v34 = vld [vmem:[%s2108_s2 + $0xb8] sm:$0xff]   ;;  %554 = vmatprep.mubr.bf16.mxu0 %v1364_v33  ;;  %v1365_v37 = vcombine.low %v42_v36, %v42_v36  ;;  %v1366_v38 = vcombine.high %v42_v36, %v42_v36  ;;  %v1658_v39 = vld [vmem:[%s2108_s2 + $0x100] sm:$0xff]  }
   0xd   :  { %1480 = vmatpush3.bf16.msra.mxu1 %v1632_v11  ;;  %v1659_v40 = vld [vmem:[%s2108_s2 + $0x180] sm:$0xff]   ;;  %v1660_v41 = vld [vmem:[%s2108_s2 + $0x148] sm:$0xff]   ;;  %v1663_v45 = vld [vmem:[%s2108_s2 + $0x150] sm:$0xff]  }
   0xe   :  { %1481 = vmatprep.subr.bf16.mxu1 %v1635_v14  ;;  %594 = vmatprep.mubr.bf16.mxu1 %v1366_v38  ;;  %v1661_v43 = vld [vmem:[%s2108_s2 + $0x108] sm:$0xff]   ;;  %v1664_v46 = vld [vmem:[%s2108_s2 + $0x110] sm:$0xff]   ;;  %v1666_v48 = vld [vmem:[%s2108_s2 + $0x158] sm:$0xff]  }
   0xf   :  { %1460 = vmatpush3.bf16.msra.mxu0 %v1634_v13  ;;  %v1662_v44 = vld [vmem:[%s2108_s2 + $0x188] sm:$0xff]   ;;  %v1665_v47 = vld [vmem:[%s2108_s2 + $0x190] sm:$0xff]   ;;  %v1667_v49 = vld [vmem:[%s2108_s2 + $0x118] sm:$0xff]  }
  0x10   :  { %1461 = vmatprep.subr.bf16.mxu0 %v1637_v16  ;;  %v1669_v50 = vld [vmem:[%s2108_s2 + $0x160] sm:$0xff]   ;;  %v1668_v51 = vld [vmem:[%s2108_s2 + $0x198] sm:$0xff]   ;;  %v1672_v53 = vld [vmem:[%s2108_s2 + $0x168] sm:$0xff]  }
  0x11   :  { %1482 = vmatpush3.bf16.msra.mxu1 %v1636_v15  ;;  %v1670_v52 = vld [vmem:[%s2108_s2 + $0x120] sm:$0xff]   ;;  %v1673_v55 = vld [vmem:[%s2108_s2 + $0x128] sm:$0xff]   ;;  %v1675_v56 = vld [vmem:[%s2108_s2 + $0x170] sm:$0xff]  }
  0x12   :  { %1483 = vmatprep.subr.bf16.mxu1 %v1639_v18  ;;  %v1671_v54 = vld [vmem:[%s2108_s2 + $0x1a0] sm:$0xff]   ;;  %v1674_v57 = vld [vmem:[%s2108_s2 + $0x1a8] sm:$0xff]   ;;  %v1676_v58 = vld [vmem:[%s2108_s2 + $0x130] sm:$0xff]  }
  0x13   :  { %1462 = vmatpush3.bf16.msra.mxu0 %v1638_v17  ;;  %v43_v59 = vld [vmem:[%s2106_s0 + $0x10] sm:$0xff]  ;;  %v1678_v62 = vld [vmem:[%s2108_s2 + $0x178] sm:$0xff]  }
  0x14   :  { %1463 = vmatprep.subr.bf16.mxu0 %v1641_v20  ;;  %v1677_v60 = vld [vmem:[%s2108_s2 + $0x1b0] sm:$0xff]   ;;  %v1368_v61 = vcombine.high %v43_v59, %v43_v59  ;;  %v1679_v63 = vld [vmem:[%s2108_s2 + $0x138] sm:$0xff]   ;;  %v1367_v1 = vcombine.low %v43_v59, %v43_v59 }
  0x15   :  { %1484 = vmatpush3.bf16.msra.mxu1 %v1640_v19  ;;  %v1682_v0 = vld [vmem:[%s2108_s2 + $0x1b8] sm:$0xff]  }
  0x16   :  { %1485 = vmatprep.subr.bf16.mxu1 %v1643_v22 }
  0x17   :  { %1464 = vmatpush3.bf16.msra.mxu0 %v1642_v21 }
  0x18   :  { %1465 = vmatprep.subr.bf16.mxu0 %v1645_v24 }
  0x19   :  { %1486 = vmatpush3.bf16.msra.mxu1 %v1644_v23 }
  0x1a   :  { %1487 = vmatprep.subr.bf16.mxu1 %v1647_v26 }
  0x1b   :  { %1466 = vmatpush3.bf16.msra.mxu0 %v1646_v25 }
  0x1c   :  { %1467 = vmatprep.subr.bf16.mxu0 %v1649_v28 }
  0x1d   :  { %1488 = vmatpush3.bf16.msra.mxu1 %v1648_v27 }
  0x1e   :  { %1489 = vmatprep.subr.bf16.mxu1 %v1651_v30 }
  0x1f   :  { %1468 = vmatpush3.bf16.msra.mxu0 %v1650_v29 }
  0x20   :  { %1497 = vmatprep.subr.bf16.mxu0 %v1655_v35 }
  0x21   :  { %1490 = vmatpush3.bf16.msra.mxu1 %v1654_v34 }
  0x22   :  { %555 = vmatmul.mubr.bf16.vlgmr.msra.gmra.mrb[0].mxu0 %v1363_v32  ;;  %1544 = vmatprep.subr.bf16.mxu1 %v1744_v42 }
  0x23   :  { %1498 = vmatpush3.bf16.msra.mxu0 %v1658_v39  ;;  %634 = vmatprep.mubr.bf16.mxu0 %v1368_v61 }
  0x24   :  { %595 = vmatmul.mubr.bf16.vlgmr.msra.gmra.mrb[0].mxu1 %v1365_v37  ;;  %1499 = vmatprep.subr.bf16.mxu0 %v1660_v41 }
  0x25   :  { %1545 = vmatpush3.bf16.msra.mxu1 %v1659_v40  ;;  %1560 = vmatprep.mubr.msk.bf16.mxu1 %vm1745_vm0, %v1744_v42 }
  0x26   :  { %1546 = vmatprep.subr.bf16.mxu1 %v1744_v42 }
  0x27   :  { %1500 = vmatpush3.bf16.msra.mxu0 %v1661_v43 }
  0x28   :  { %1501 = vmatprep.subr.bf16.mxu0 %v1663_v45 }
  0x29   :  { %1547 = vmatpush3.bf16.msra.mxu1 %v1662_v44 }
  0x2a   :  { %1548 = vmatprep.subr.bf16.mxu1 %v1744_v42 }
  0x2b   :  { %1502 = vmatpush3.bf16.msra.mxu0 %v1664_v46 }
  0x2c   :  { %1503 = vmatprep.subr.bf16.mxu0 %v1666_v48 }
  0x2d   :  { %1549 = vmatpush3.bf16.msra.mxu1 %v1665_v47 }
  0x2e   :  { %1550 = vmatprep.subr.bf16.mxu1 %v1744_v42 }
  0x2f   :  { %1504 = vmatpush3.bf16.msra.mxu0 %v1667_v49 }
  0x30   :  { %1505 = vmatprep.subr.bf16.mxu0 %v1669_v50 }
  0x31   :  { %1551 = vmatpush3.bf16.msra.mxu1 %v1668_v51 }
  0x32   :  { %1552 = vmatprep.subr.bf16.mxu1 %v1744_v42 }
  0x33   :  { %1506 = vmatpush3.bf16.msra.mxu0 %v1670_v52 }
  0x34   :  { %1507 = vmatprep.subr.bf16.mxu0 %v1672_v53 }
  0x35   :  { %1553 = vmatpush3.bf16.msra.mxu1 %v1671_v54 }
  0x36   :  { %1554 = vmatprep.subr.bf16.mxu1 %v1744_v42 }
  0x37   :  { %1508 = vmatpush3.bf16.msra.mxu0 %v1673_v55 }
  0x38   :  { %1509 = vmatprep.subr.bf16.mxu0 %v1675_v56 }
  0x39   :  { %1555 = vmatpush3.bf16.msra.mxu1 %v1674_v57 }
  0x3a   :  { %1556 = vmatprep.subr.bf16.mxu1 %v1744_v42 }
  0x3b   :  { %1510 = vmatpush3.bf16.msra.mxu0 %v1676_v58 }
  0x3c   :  { %1511 = vmatprep.subr.bf16.mxu0 %v1678_v62 }
  0x3d   :  { %1557 = vmatpush3.bf16.msra.mxu1 %v1677_v60 }
  0x3e   :  { %1558 = vmatprep.subr.bf16.mxu1 %v1744_v42 }
  0x3f   :  { %13 = vsyncpa [#allocation3], 0  ;;  %1512 = vmatpush3.bf16.msra.mxu0 %v1679_v63  ;;  %v1683_v2 = vld [vmem:[%s2106_s0 + $0x18] ss:$0 sps:$4 sm:$0xff]   ;;  %v28_v3 = vld [vmem:[%s2111_s5 + $0x8] sm:$0xff]  ;;  %v1746_v6 = vmov 0.0|0.0  }
  0x40   :  { %v29_v4 = vld [vmem:[%s2111_s5 + $0x10] sm:$0xff]  ;;  %1602 = vmatprep.subr.bf16.mxu0 %v1746_v6  ;;  %v30_v7 = vld [vmem:[%s2111_s5 + $0x18] sm:$0xff]  ;;  %v31_v8 = vld [vmem:[%s2111_s5 + $0x20] sm:$0xff]  ;;  %vm687_vm1 = vcmask 261120   ;;  %s1747_s20 = smov 2   ;;  %vm766_vm2 = vcmask 130048  }
  0x41   :  { %1559 = vmatpush3.bf16.msra.mxu1 %v1682_v0  ;;  %v1603_v5 = vpack.c.bf16 %v29_v4, %v28_v3  ;;  %v1606_v9 = vpack.c.bf16 %v31_v8, %v30_v7  ;;  %v33_v10 = vld [vmem:[%s2111_s5 + $0x30] sm:$0xff]  ;;  %v34_v11 = vld [vmem:[%s2111_s5 + $0x38] sm:$0xff]  ;;  %v1362_v14 = vld [vmem:[%s2111_s5] ss:$0 sm:$0xff]  ;;  %vm862_vm3 = vcmask 1041408   ;;  %vm1342_vm4 = vcmask 31744  }
  0x42   :  { %635 = vmatmul.mubr.bf16.vlgmr.msra.gmra.mrb[4].mxu0 %v1367_v1  ;;  %1608 = vmatprep.subr.bf16.mxu1 %v1746_v6  ;;  %v1609_v12 = vpack.c.bf16 %v34_v11, %v33_v10  ;;  %v843_v38 = vld [vmem:[%s2107_s1] sm:$0xff]  ;;  %v1426_v39 = vld [vmem:[%s2111_s5 + $0x28] ss:$0 sm:$0xff]  ;;  %s1748_s28 = smov 126   ;;  %vm858_vm5 = vcmask 15360   ;;  %v38_v57 = vld [vmem:[%s2111_s5 + $0x58] sm:$0xff] }
  0x43   :  { %1572 = vmatprep.mubr.msk.f32.mxu0 %vm1745_vm0, %v1744_v42  ;;  %1604 = vmatpush3.bf16.msra.mxu0 %v1603_v5  ;;  %v36_v45 = vld [vmem:[%s2111_s5 + $0x48] sm:$0x3]  ;;  %v1428_v46 = vld [vmem:[%s2111_s5 + $0x40] ss:$0 sm:$0xff]  ;;  %v1430_v63 = vld [vmem:[%s2111_s5 + $0x50] ss:$0 sm:$0xff] }
  0x44   :  { %1561 = vmatmul.mubr.bf16.vlgmr.msra.gmra.mrb[4].mxu1 %v1683_v2  ;;  %1605 = vmatprep.subr.bf16.mxu0 %v1746_v6  ;;  %v39_v58 = vld [vmem:[%s2111_s5 + $0x60] sm:$0xff]  ;;  %v1689_v62 = vld [vmem:[%s2109_s3 + $0xc] ss:$28 sps:$4 sm:$0xff]   ;;  %v1692_v5 = vld [vmem:[%s2109_s3 + $0x3c] ss:$28 sps:$4 sm:$0xff]   ;;  %v1749_v10 = vmov 0  }
  0x45   :  { %1579 = vmatprep.mubr.msk.f32.mxu1 %vm1745_vm0, %v1744_v42  ;;  %1610 = vmatpush3.bf16.msra.mxu1 %v1609_v12  ;;  %v1612_v59 = vpack.c.bf16 %v39_v58, %v38_v57  ;;  %v1684_v60 = vld [vmem:[%s2109_s3] ss:$28 sps:$4 sm:$0xff]   ;;  %v1687_v3 = vld [vmem:[%s2109_s3 + $0x8] ss:$28 sps:$4 sm:$0xff]   ;;  %v1690_v7 = vld [vmem:[%s2109_s3 + $0x38] ss:$28 sps:$4 sm:$0xff]  }
  0x46   :  { %1611 = vmatprep.subr.bf16.mxu1 %v1746_v6  ;;  %845 = vrot.lane.b32.xlu0 %v843_v38, %s1747_s20  ;;  %v1686_v61 = vld [vmem:[%s2109_s3 + $0x4] ss:$28 sps:$4 sm:$0xff]   ;;  %v1433_v11 = vld [vmem:[%s2111_s5 + $0x68] ss:$0 sm:$0xff] }
  0x47   :  { %1607 = vmatpush3.bf16.msra.mxu0 %v1606_v9  ;;  %v1695_v6 = vld [vmem:[%s2109_s3 + $0x44] ss:$28 sps:$4 sm:$0xff]   ;;  %v1698_v9 = vld [vmem:[%s2109_s3 + $0x14] ss:$28 sps:$4 sm:$0xff]  }
  0x48   :  { %1582 = vmatprep.subr.mxu0 %v1744_v42  ;;  %v1693_v8 = vld [vmem:[%s2109_s3 + $0x40] ss:$28 sps:$4 sm:$0xff]  }
  0xb8   :  { %v846_v52 = vpop.permute.xlu0 %845 }
  0xf5   :  { %v1469_v13 = vpop.f32.mrb[0].mxu0 }
  0xf6   :  { %v1470_v15 = vpop.f32.mrb[1].mxu0 }
  0xf7   :  { %v1471_v16 = vadd.f32 %v1470_v15, %v1469_v13  ;;  %v1472_v17 = vpop.f32.mrb[2].mxu0  ;;  %v1491_v18 = vpop.f32.mrb[0].mxu1 }
  0xf8   :  { %v1473_v19 = vpop.f32.mrb[3].mxu0  ;;  %v1492_v20 = vpop.f32.mrb[1].mxu1  ;;  %v1699_v17 = vld [vmem:[%s2109_s3 + $0x18] ss:$28 sps:$4 sm:$0xff]  }
  0xf9   :  { %v557_v21 = vadd.f32 %v1471_v16, %v1362_v14  ;;  %v1493_v22 = vadd.f32 %v1492_v20, %v1491_v18  ;;  %v1494_v23 = vpop.f32.mrb[2].mxu1  ;;  %v1696_v16 = vld [vmem:[%s2109_s3 + $0x10] ss:$28 sps:$4 sm:$0xff]   ;;  %v1700_v20 = vld [vmem:[%s2109_s3 + $0x48] ss:$28 sps:$4 sm:$0xff]  }
  0xfa   :  { %v1495_v24 = vpop.f32.mrb[3].mxu1  ;;  %v1702_v19 = vld [vmem:[%s2109_s3 + $0x4c] ss:$28 sps:$4 sm:$0xff]  }
  0xfb   :  { %v597_v25 = vadd.f32 %v1493_v22, %v557_v21  ;;  %v1703_v21 = vld [vmem:[%s2109_s3 + $0x50] ss:$28 sps:$4 sm:$0xff]   ;;  %v1034_v22 = vlaneseq  ;;  %s1750_s3 = smov [#allocation2]  }
  0xfd   :  { %v1035_v23 = vshrl.u32 %v1034_v22, 7 }
  0xff   :  { %v1036_v24 = vsub.s32 0, %v1035_v23  ;;  %v1052_v38 = vsub.s32 4, %v1035_v23 }
 0x115   :  { %v1513_v26 = vpop.f32.mrb[4].mxu0 }
 0x116   :  { %v1514_v27 = vpop.f32.mrb[5].mxu0 }
 0x117   :  { %v1515_v28 = vadd.f32 %v1514_v27, %v1513_v26  ;;  %v1516_v29 = vpop.f32.mrb[6].mxu0  ;;  %v676_v30 = vpop.f32.mrb[4].mxu1  ;;  %v1032_v26 = vld [vmem:[%s2110_s4] sm:$0xff]  ;;  %v1040_v27 = vsub.s32 1, %v1035_v23  ;;  %s1350_s4 = sshll.u32 %s1750_s3, 4  ;;  %s1351_s4 = int_to_ptr.vmem [resolvable:$true] %s1350_s4 }
 0x118   :  { %v1517_v31 = vpop.f32.mrb[7].mxu0  ;;  %v1562_v32 = vpop.f32.mrb[5].mxu1  ;;  %v1037_v29 = vrot.slane %v1032_v26, %v1036_v24  ;;  %s1720_s13 = scalar_lea.vmem %s1351_s4, 896  ;;  %p1725_p1 = scmp.lt.s32.totalorder %s1351_s4, %s1351_s4 }
 0x119   :  { %v637_v33 = vadd.f32 %v1515_v28, %v597_v25  ;;  %v679_v34 = vpop.f32.mrb[6].mxu1  ;;  %v1044_v25 = vsub.s32 2, %v1035_v23  ;;  %v1048_v28 = vsub.s32 3, %v1035_v23  ;;  %v1041_v31 = vrot.slane %v1032_v26, %v1040_v27  ;;  %p1721_p0 = scmp.ne.s32.totalorder %s1351_s4, %s1720_s13  ;;  %p1726_p2 = scmp.lt.s32.totalorder %s1720_s13, %s1720_s13 }
 0x11a   :  { %v1563_v35 = vpop.f32.mrb[7].mxu1 }
 0x11b   :  { %v677_v36 = vadd.f32 %v676_v30, %v637_v33  ;;  %v1045_v30 = vrot.slane %v1032_v26, %v1044_v25  ;;  %p1727_p3 = por %p1726_p2, %p1725_p1 }
 0x11d   :  { %v682_v37 = vmax.f32 %v677_v36, 0.0  ;;  %p1728_p4 = pnand %p1727_p3, %p1721_p0 }
 0x11f   :  { %1573 = vmatmul.mubr.msk.f32.vlgmr.msra.gmra.mrb[8].mxu0 %vm687_vm1, %v682_v37 }
 0x120   :  { %1584 = vmatprep.mubr.msk.f32.mxu0 %vm1745_vm0, %v1744_v42  ;;  %1583 = vmatpush3.msk.msra.mxu0 %vm862_vm3, %v36_v45  ;;  %v1056_v45 = vsub.s32 5, %v1035_v23 }
 0x121   :  { %1144 = vmatprep.subr.bf16.mxu0 %v1686_v61 }
 0x1f2   :  { %v757_v40 = vpop.f32.mrb[8].mxu0 }
 0x1f3   :  { %v758_v41 = vadd.f32 %v1426_v39, %v757_v40  ;;  %v1574_v43 = vpop.f32.mrb[9].mxu0  ;;  %v1060_v39 = vsub.s32 6, %v1035_v23 }
 0x1f5   :  { %v761_v44 = vmax.f32 %v758_v41, 0.0 }
 0x1f7   :  { %1580 = vmatmul.mubr.msk.f32.vlgmr.msra.gmra.mrb[8].mxu1 %vm766_vm2, %v761_v44 }
 0x1f8   :  { %1591 = vmatprep.mubr.msk.f32.mxu1 %vm1745_vm0, %v1744_v42  ;;  %1613 = vmatpush3.bf16.msra.mxu1 %v1612_v59 }
 0x1f9   :  { %1185 = vmatprep.subr.bf16.mxu1 %v1689_v62 }
 0x2ca   :  { %v836_v47 = vpop.f32.mrb[8].mxu1 }
 0x2cb   :  { %v837_v48 = vadd.f32 %v1428_v46, %v836_v47  ;;  %v1581_v49 = vpop.f32.mrb[9].mxu1 }
 0x2cd   :  { %v840_v50 = vmul.f32 0.5, %v837_v48  ;;  %1343 = vst.msk [vmem:[%s2113_s7] sm:$0xff] %vm1342_vm4, %v837_v48 }
 0x2cf   :  { %v841_v51 = vmul.f32 1.442695, %v840_v50 }
 0x2d1   :  { %1704 = vpow2.f32 %v841_v51 }
 0x2db   :  { %v1705_v53 = vpop.eup %1704 }
 0x2dc   :  { %v848_v54 = vmul.f32 %v1705_v53, %v846_v52  ;;  %v1053_v52 = vrot.slane %v1032_v26, %v1052_v38  ;;  %v1061_v53 = vrot.slane %v1032_v26, %v1060_v39 }
 0x2de   :  { %850 = vrot.lane.b32.xlu0 %v848_v54, %s1748_s28  ;;  %v1057_v54 = vrot.slane %v1032_v26, %v1056_v45 }
 0x350   :  { %v851_v55 = vpop.permute.xlu0 %850 }
 0x351   :  { %v853_v56 = vadd.f32 %v851_v55, %v837_v48 }
 0x353   :  { %1585 = vmatmul.mubr.msk.f32.vlgmr.msra.gmra.mrb[10].mxu0 %vm858_vm5, %v853_v56 }
 0x354   :  { %1145 = vmatpush1.bf16.msra.mxu0 %v1684_v60  ;;  %1176 = vmatprep.mubr.bf16.mxu0 %v1749_v10 }
 0x355   :  { %1146 = vmatprep.subr.bf16.mxu0 %v1692_v5 }
 0x358   :  { %1147 = vmatpush1.bf16.msra.mxu0 %v1690_v7 }
 0x359   :  { %1226 = vmatprep.subr.bf16.mxu0 %v1698_v9 }
 0x426   :  { %v932_v0 = vpop.f32.mrb[10].mxu0 }
 0x427   :  { %v933_v1 = vadd.f32 %v1430_v63, %v932_v0  ;;  %v1586_v2 = vpop.f32.mrb[11].mxu0 }
 0x429   :  { %v936_v4 = vmax.f32 %v933_v1, 0.0 }
 0x42b   :  { %1592 = vmatmul.mubr.msk.f32.vlgmr.msra.gmra.mrb[10].mxu1 %vm766_vm2, %v936_v4 }
 0x42c   :  { %1186 = vmatpush1.bf16.msra.mxu1 %v1687_v3  ;;  %1217 = vmatprep.mubr.bf16.mxu1 %v1749_v10 }
 0x42d   :  { %1187 = vmatprep.subr.bf16.mxu1 %v1695_v6 }
 0x430   :  { %1188 = vmatpush1.bf16.msra.mxu1 %v1693_v8 }
 0x431   :  { %1594 = vmatprep.subr.bf16.mxu1 %v1744_v42 }
 0x4fe   :  { %v1010_v12 = vpop.f32.mrb[10].mxu1 }
 0x4ff   :  { %v1011_v13 = vadd.f32 %v1433_v11, %v1010_v12  ;;  %v1593_v14 = vpop.f32.mrb[11].mxu1 }
 0x501   :  { %v1014_v15 = vmax.f32 %v1011_v13, 0.0 }
 0x503   :  { %v1015_v18 = vpack.c.bf16 %v1014_v15, %v1014_v15 }
 0x505   :  { %1449 = vmatmul.mubr.msk.bf16.vlgmr.msra.gmra.mrb[12].mxu0 %vm687_vm1, %v1015_v18  ;;  %1450 = vmatmul.mubr.msk.bf16.vlgmr.msra.gmra.mrb[12].mxu1 %vm687_vm1, %v1015_v18 }
 0x506   :  { %1227 = vmatpush1.bf16.msra.mxu0 %v1696_v16  ;;  %1595 = vmatpush3.bf16.msra.mxu1 %v1699_v17 }
 0x507   :  { %1228 = vmatprep.subr.bf16.mxu0 %v1702_v19  ;;  %1596 = vmatprep.subr.bf16.mxu1 %v1744_v42 }
 0x508   :  { %1258 = vmatprep.mubr.bf16.mxu0 %v1749_v10  ;;  %1598 = vmatprep.mubr.msk.bf16.mxu1 %vm1745_vm0, %v1744_v42  ;;  %v1049_v42 = vrot.slane %v1032_v26, %v1048_v28 }
 0x50a   :  { %1229 = vmatpush1.bf16.msra.mxu0 %v1700_v20  ;;  %1597 = vmatpush3.bf16.msra.mxu1 %v1703_v21 }
 0x50d   :  { %1451 = vmatmul.mubr.msk.bf16.vlgmr.msra.gmra.mrb[16].mxu0 %vm687_vm1, %v1015_v18  ;;  %1599 = vmatmul.mubr.msk.bf16.vlgmr.msra.gmra.mrb[16].mxu1 %vm687_vm1, %v1015_v18 }
 0x5d8   :  { %v1178_v32 = vpop.f32.mrb[12].mxu0  ;;  %v1219_v33 = vpop.f32.mrb[12].mxu1 }
 0x5d9   :  { %v1179_v34 = vadd.f32 %v1178_v32, %v1037_v29  ;;  %v1220_v35 = vadd.f32 %v1219_v33, %v1045_v30  ;;  %v1180_v36 = vpop.f32.mrb[13].mxu0  ;;  %v1221_v37 = vpop.f32.mrb[13].mxu1 }
 0x5da   :  { %v1181_v40 = vadd.f32 %v1180_v36, %v1041_v31  ;;  %v1222_v41 = vadd.f32 %v1221_v37, %v1049_v42  ;;  %v1182_v43 = vpop.f32.mrb[14].mxu0  ;;  %v1223_v44 = vpop.f32.mrb[14].mxu1 }
 0x5db   :  { %v1307_v46 = vmul.f32 0.5, %v1179_v34  ;;  %v1309_v47 = vmul.f32 0.5, %v1220_v35  ;;  %v1183_v48 = vpop.f32.mrb[15].mxu0  ;;  %v1224_v49 = vpop.f32.mrb[15].mxu1 }
 0x5dc   :  { %v1308_v50 = vmul.f32 0.5, %v1181_v40  ;;  %v1310_v51 = vmul.f32 0.5, %v1222_v41 }
 0x5dd   :  { %1706 = vtanh.f32 %v1307_v46 }
 0x5de   :  { %1708 = vtanh.f32 %v1309_v47 }
 0x5df   :  { %1710 = vtanh.f32 %v1308_v50 }
 0x5e0   :  { %1712 = vtanh.f32 %v1310_v51  ;;  %v1260_v55 = vpop.f32.mrb[16].mxu0  ;;  %v1301_v56 = vpop.f32.mrb[16].mxu1 }
 0x5e1   :  { %v1261_v57 = vadd.f32 %v1260_v55, %v1053_v52  ;;  %v1302_v58 = vadd.f32 %v1301_v56, %v1061_v53  ;;  %v1262_v59 = vpop.f32.mrb[17].mxu0  ;;  %v1600_v60 = vpop.f32.mrb[17].mxu1 }
 0x5e2   :  { %v1263_v61 = vadd.f32 %v1262_v59, %v1057_v54  ;;  %v1264_v62 = vpop.f32.mrb[18].mxu0  ;;  %v1304_v63 = vpop.f32.mrb[18].mxu1 }
 0x5e3   :  { %v1311_v0 = vmul.f32 0.5, %v1261_v57  ;;  %v1313_v1 = vmul.f32 0.5, %v1302_v58  ;;  %v1265_v2 = vpop.f32.mrb[19].mxu0  ;;  %v1601_v3 = vpop.f32.mrb[19].mxu1 }
 0x5e4   :  { %v1312_v4 = vmul.f32 0.5, %v1263_v61 }
 0x5e5   :  { %1714 = vtanh.f32 %v1311_v0 }
 0x5e6   :  { %1716 = vtanh.f32 %v1313_v1 }
 0x5e7   :  { %v1707_v5 = vpop.eup %1706  ;;  %1718 = vtanh.f32 %v1312_v4 }
 0x5e8   :  { %v1709_v6 = vpop.eup %1708  ;;  %v1321_v7 = vadd.f32 1.0, %v1707_v5 }
 0x5e9   :  { %v1711_v8 = vpop.eup %1710  ;;  %v1323_v9 = vadd.f32 1.0, %v1709_v6 }
 0x5ea   :  { %v1713_v10 = vpop.eup %1712  ;;  %v1328_v11 = vmul.f32 0.5, %v1321_v7  ;;  %v1322_v12 = vadd.f32 1.0, %v1711_v8 }
 0x5eb   :  { %v1330_v13 = vmul.f32 0.5, %v1323_v9  ;;  %v1324_v14 = vadd.f32 1.0, %v1713_v10 }
 0x5ec   :  { %1335 = vst [vmem:[#allocation2] sm:$0xff] %v1328_v11  ;;  %v1329_v15 = vmul.f32 0.5, %v1322_v12 }
 0x5ed   :  { %1337 = vst [vmem:[#allocation2 + $0x10] sm:$0xff] %v1330_v13  ;;  %v1331_v16 = vmul.f32 0.5, %v1324_v14 }
 0x5ee   :  { %1336 = vst [vmem:[#allocation2 + $0x8] sm:$0xff] %v1329_v15 }
 0x5ef   :  { %v1715_v17 = vpop.eup %1714  ;;  %1338 = vst [vmem:[#allocation2 + $0x18] sm:$0xff] %v1331_v16 }
 0x5f0   :  { %v1717_v18 = vpop.eup %1716  ;;  %v1325_v19 = vadd.f32 1.0, %v1715_v17 }
 0x5f1   :  { %v1719_v20 = vpop.eup %1718  ;;  %v1327_v21 = vadd.f32 1.0, %v1717_v18 }
 0x5f2   :  { %v1332_v22 = vmul.f32 0.5, %v1325_v19  ;;  %v1326_v23 = vadd.f32 1.0, %v1719_v20 }
 0x5f3   :  { %v1334_v24 = vmul.f32 0.5, %v1327_v21 }
 0x5f4   :  { %1339 = vst [vmem:[#allocation2 + $0x20] sm:$0xff] %v1332_v22  ;;  %v1333_v25 = vmul.f32 0.5, %v1326_v23 }
 0x5f5   :  { %1341 = vst [vmem:[#allocation2 + $0x30] sm:$0xff] %v1334_v24 }
 0x5f6   :  { %1340 = vst [vmem:[#allocation2 + $0x28] sm:$0xff] %v1333_v25 }
 0x5f7   :  { %1731 = shalt.err (!%p1728_p4)
}
 0x5f8   :  { %s1732_s16 = scalar_lea.hbm %s2112_s6, 896 }
 0x5f9   :  { %p1733_p5 = scmp.ne.s32.totalorder %s2112_s6, %s1732_s16  ;;  %p1736_p6 = scmp.lt.u32.totalorder %s1732_s16, %s2112_s6 }
 0x5fb   :  { %p1738_p7 = pnand %p1736_p6, %p1733_p5 }
 0x5fd   :  { %1741 = shalt.err (!%p1738_p7)
}
 0x5fe   :  { %1353 = dma.vmem_to_hbm [thread:$0]  %s1351_s4, 896, %s2112_s6, [#allocation3]  }
 0x5ff   :  { %1742 = dma.done.wait [#allocation3], 896  }
 0x600   :  { %1743 = vsyncadd [#allocation3], 4294966400 }
 0x601   :  { %1361 = vsyncpa [#allocation3], 1 }

</bundles_post_ra>
